<compile_context>
chip_gen: v6e
topology: v6e:2x2x1
jax: 0.10.0
libtpu: 0.0.40
codegen_flags: <defaults>
</compile_context>

<pallas_src>
import functools

import jax
import jax.numpy as jnp
from jax.experimental import pallas as pl
from jax.experimental.pallas import tpu as pltpu

# Constants the PyTorch snippet references but does not define.
MID_LAYER_NODE_NUM = 128
ACTION_SCALE = 2.0
LEAKY_SLOPE = 0.001

_LANE = 128      # lane width (last-dim tiling unit)
_SUBLANE = 8     # f32 sublane count (second-to-last-dim tiling unit)
_MAX_BATCH_TILE = 256


def _round_up(n, m):
    return ((n + m - 1) // m) * m


def _leaky_relu(x, negative_slope):
    return jnp.where(x >= 0, x, negative_slope * x)


def actor_kernel(x_ref, w1_ref, b1_ref, w2_ref, b2_ref, w3_ref, b3_ref, o_ref):
    # Layer 1: (TB, F) @ (F, M). MXU operands may be bf16; accumulate in f32.
    h = jnp.dot(x_ref[...], w1_ref[...], preferred_element_type=jnp.float32)
    h = _leaky_relu(h + b1_ref[...], LEAKY_SLOPE)            # f32 epilogue (VPU)

    # Layer 2: (TB, M) @ (M, M)
    h = jnp.dot(h.astype(w2_ref.dtype), w2_ref[...],
                preferred_element_type=jnp.float32)
    h = _leaky_relu(h + b2_ref[...], LEAKY_SLOPE)

    # Layer 3: (TB, M) @ (M, A_pad), then tanh (EUP) and scale.
    h = jnp.dot(h.astype(w3_ref.dtype), w3_ref[...],
                preferred_element_type=jnp.float32)
    h = jnp.tanh(h + b3_ref[...]) * ACTION_SCALE

    o_ref[...] = h.astype(o_ref.dtype)


def actor_forward(x, params, *, batch_tile=_MAX_BATCH_TILE, use_bf16=True):
    """x: (B, fea_num) float32. params: dict of w1,b1,w2,b2,w3,b3 (f32 masters)."""
    w1, b1 = params["w1"], params["b1"]
    w2, b2 = params["w2"], params["b2"]
    w3, b3 = params["w3"], params["b3"]

    B, F = x.shape
    M = w1.shape[1]
    A = w3.shape[1]

    # --- Lane-dense output: pad the action dim up to a multiple of 128. ---
    A_pad = _round_up(A, _LANE)
    if A_pad != A:
        w3 = jnp.pad(w3, ((0, 0), (0, A_pad - A)))
        b3 = jnp.pad(b3, ((0, 0), (0, A_pad - A)))

    # --- Batch tiling: TB multiple of 8 sublanes, capped (vreg/VMEM pressure). ---
    TB = min(batch_tile, _round_up(B, _SUBLANE))
    TB = _round_up(TB, _SUBLANE)
    B_pad = _round_up(B, TB)
    if B_pad != B:
        x = jnp.pad(x, ((0, B_pad - B), (0, 0)))

    # --- bf16 MXU operands; biases + epilogue stay f32. ---
    compute_dtype = jnp.bfloat16 if use_bf16 else x.dtype
    xk = x.astype(compute_dtype)
    w1k = w1.astype(compute_dtype)
    w2k = w2.astype(compute_dtype)
    w3k = w3.astype(compute_dtype)

    grid = (pl.cdiv(B_pad, TB),)

    # Weights/biases: one full block, same block index every grid step
    # (stay resident in VMEM across the batch loop).
    def full_spec(arr):
        return pl.BlockSpec(arr.shape, lambda i: tuple(0 for _ in arr.shape))

    in_specs = [
        pl.BlockSpec((TB, F), lambda i: (i, 0)),   # x: blocked over batch
        full_spec(w1k), full_spec(b1),
        full_spec(w2k), full_spec(b2),
        full_spec(w3k), full_spec(b3),
    ]
    out_specs = pl.BlockSpec((TB, A_pad), lambda i: (i, 0))

    operands = (xk, w1k, b1, w2k, b2, w3k, b3)
    out_bytes = B_pad * A_pad * 4
    cost = pl.CostEstimate(
        flops=2 * B_pad * (F * M + M * M + M * A_pad),
        transcendentals=B_pad * A_pad,                      # tanh
        bytes_accessed=sum(int(a.size) * a.dtype.itemsize for a in operands)
                       + out_bytes,
    )

    out = pl.pallas_call(
        actor_kernel,
        out_shape=jax.ShapeDtypeStruct((B_pad, A_pad), jnp.float32),
        grid=grid,
        in_specs=in_specs,
        out_specs=out_specs,
        compiler_params=pltpu.CompilerParams(
            dimension_semantics=("parallel",),
        ),
        cost_estimate=cost,
    )(*operands)

    return out[:B, :A]


def init_actor_params(key, fea_num, action_num, mid=MID_LAYER_NODE_NUM):
    """Deterministic PyTorch-Linear-style init (uniform +/- 1/sqrt(fan_in)).
    Weights stored as (in_features, out_features); biases as (1, out_features)."""
    ks = jax.random.split(key, 6)

    def lin(kw, kb, fan_in, fan_out):
        bound = 1.0 / jnp.sqrt(fan_in)
        w = jax.random.uniform(kw, (fan_in, fan_out), jnp.float32, -bound, bound)
        b = jax.random.uniform(kb, (1, fan_out), jnp.float32, -bound, bound)
        return w, b

    w1, b1 = lin(ks[0], ks[1], fea_num, mid)
    w2, b2 = lin(ks[2], ks[3], mid, mid)
    w3, b3 = lin(ks[4], ks[5], mid, action_num)
    return {"w1": w1, "b1": b1, "w2": w2, "b2": b2, "w3": w3, "b3": b3}


def actor_reference(x, params):
    """Plain-JAX f32 reference matching the PyTorch forward."""
    h = _leaky_relu(x @ params["w1"] + params["b1"], LEAKY_SLOPE)
    h = _leaky_relu(h @ params["w2"] + params["b2"], LEAKY_SLOPE)
    return jnp.tanh(h @ params["w3"] + params["b3"]) * ACTION_SCALE


if __name__ == "__main__":
    key = jax.random.PRNGKey(0)
    k_param, k_x1, k_x2 = jax.random.split(key, 3)

    fea_num = 32
    action_num = 8
    params = init_actor_params(k_param, fea_num, action_num)

    # --- Small batch (matches the module's intended usage). ---
    x_small = jax.random.normal(k_x1, (8, fea_num), dtype=jnp.float32)
    ref_small = actor_reference(x_small, params)

    # f32 path: exact semantics check.
    out_f32 = jax.block_until_ready(actor_forward(x_small, params, use_bf16=False))
    assert out_f32.shape == (8, action_num)
    assert jnp.allclose(out_f32, ref_small, atol=1e-5, rtol=1e-5), "f32 mismatch"

    # bf16-MXU path: relaxed tolerance.
    out_bf16 = jax.block_until_ready(actor_forward(x_small, params, use_bf16=True))
    assert jnp.allclose(out_bf16, ref_small, atol=3e-2, rtol=3e-2), "bf16 mismatch"

    # --- Larger batch: exercises the batch grid (2 tiles of 256) + padding slice. ---
    x_big = jax.random.normal(k_x2, (512, fea_num), dtype=jnp.float32)
    out_big = jax.block_until_ready(actor_forward(x_big, params, use_bf16=True))
    ref_big = actor_reference(x_big, params)
    assert out_big.shape == (512, action_num)
    assert jnp.allclose(out_big, ref_big, atol=3e-2, rtol=3e-2), "batched mismatch"

    print("KERNEL_OK")
</pallas_src>

<mosaic_0001>
module attributes {stable_mosaic.version = 11 : i64} {
  func.func @actor_kernel(%arg0: i32, %arg1: memref<8x32xf32, #tpu.memory_space<vmem>>, %arg2: memref<32x128xf32, #tpu.memory_space<vmem>>, %arg3: memref<1x128xf32, #tpu.memory_space<vmem>>, %arg4: memref<128x128xf32, #tpu.memory_space<vmem>>, %arg5: memref<1x128xf32, #tpu.memory_space<vmem>>, %arg6: memref<128x128xf32, #tpu.memory_space<vmem>>, %arg7: memref<1x128xf32, #tpu.memory_space<vmem>>, %arg8: memref<8x128xf32, #tpu.memory_space<vmem>>) attributes {dimension_semantics = [#tpu.dimension_semantics<parallel>], iteration_bounds = array<i64: 1>, scalar_prefetch = 0 : i64, scratch_operands = 0 : i64, tpu.core_type = #tpu.core_type<tc>, window_params = [{transform_indices = @transform_0, window_bounds = array<i64: 8, 32>}, {pipeline_mode = #tpu.pipeline_mode<synchronous>, transform_indices = @transform_1, window_bounds = array<i64: 32, 128>}, {pipeline_mode = #tpu.pipeline_mode<synchronous>, transform_indices = @transform_2, window_bounds = array<i64: 1, 128>}, {pipeline_mode = #tpu.pipeline_mode<synchronous>, transform_indices = @transform_3, window_bounds = array<i64: 128, 128>}, {pipeline_mode = #tpu.pipeline_mode<synchronous>, transform_indices = @transform_4, window_bounds = array<i64: 1, 128>}, {pipeline_mode = #tpu.pipeline_mode<synchronous>, transform_indices = @transform_5, window_bounds = array<i64: 128, 128>}, {pipeline_mode = #tpu.pipeline_mode<synchronous>, transform_indices = @transform_6, window_bounds = array<i64: 1, 128>}, {transform_indices = @transform_7, window_bounds = array<i64: 8, 128>}]} {
    %c0 = arith.constant 0 : index
    %c0_0 = arith.constant 0 : index
    %0 = vector.load %arg1[%c0, %c0_0] : memref<8x32xf32, #tpu.memory_space<vmem>>, vector<8x32xf32>
    %c0_1 = arith.constant 0 : index
    %c0_2 = arith.constant 0 : index
    %1 = vector.load %arg2[%c0_1, %c0_2] : memref<32x128xf32, #tpu.memory_space<vmem>>, vector<32x128xf32>
    %cst = arith.constant dense<0.000000e+00> : vector<8x128xf32>
    %2 = tpu.matmul %0, %1, %cst {dimension_numbers = #tpu.dot_dimension_numbers<[1], [0], [0], [1], [0, 0, 1, 1], [], []>} : vector<8x32xf32>, vector<32x128xf32>, vector<8x128xf32> -> vector<8x128xf32>
    %c0_3 = arith.constant 0 : index
    %c0_4 = arith.constant 0 : index
    %3 = vector.load %arg3[%c0_3, %c0_4] : memref<1x128xf32, #tpu.memory_space<vmem>>, vector<1x128xf32>
    %4 = vector.broadcast %3 : vector<1x128xf32> to vector<8x128xf32>
    %5 = arith.addf %2, %4 : vector<8x128xf32>
    %cst_5 = arith.constant 0.000000e+00 : f32
    %6 = vector.broadcast %cst_5 : f32 to vector<8x128xf32>
    %7 = arith.cmpf oge, %5, %6 : vector<8x128xf32>
    %cst_6 = arith.constant 1.000000e-03 : f32
    %8 = vector.broadcast %cst_6 : f32 to vector<8x128xf32>
    %9 = arith.mulf %8, %5 : vector<8x128xf32>
    %10 = arith.select %7, %5, %9 : vector<8x128xi1>, vector<8x128xf32>
    %c0_7 = arith.constant 0 : index
    %c0_8 = arith.constant 0 : index
    %11 = vector.load %arg4[%c0_7, %c0_8] : memref<128x128xf32, #tpu.memory_space<vmem>>, vector<128x128xf32>
    %cst_9 = arith.constant dense<0.000000e+00> : vector<8x128xf32>
    %12 = tpu.matmul %10, %11, %cst_9 {dimension_numbers = #tpu.dot_dimension_numbers<[1], [0], [0], [1], [0, 0, 1, 1], [], []>} : vector<8x128xf32>, vector<128x128xf32>, vector<8x128xf32> -> vector<8x128xf32>
    %c0_10 = arith.constant 0 : index
    %c0_11 = arith.constant 0 : index
    %13 = vector.load %arg5[%c0_10, %c0_11] : memref<1x128xf32, #tpu.memory_space<vmem>>, vector<1x128xf32>
    %14 = vector.broadcast %13 : vector<1x128xf32> to vector<8x128xf32>
    %15 = arith.addf %12, %14 : vector<8x128xf32>
    %cst_12 = arith.constant 0.000000e+00 : f32
    %16 = vector.broadcast %cst_12 : f32 to vector<8x128xf32>
    %17 = arith.cmpf oge, %15, %16 : vector<8x128xf32>
    %cst_13 = arith.constant 1.000000e-03 : f32
    %18 = vector.broadcast %cst_13 : f32 to vector<8x128xf32>
    %19 = arith.mulf %18, %15 : vector<8x128xf32>
    %20 = arith.select %17, %15, %19 : vector<8x128xi1>, vector<8x128xf32>
    %c0_14 = arith.constant 0 : index
    %c0_15 = arith.constant 0 : index
    %21 = vector.load %arg6[%c0_14, %c0_15] : memref<128x128xf32, #tpu.memory_space<vmem>>, vector<128x128xf32>
    %cst_16 = arith.constant dense<0.000000e+00> : vector<8x128xf32>
    %22 = tpu.matmul %20, %21, %cst_16 {dimension_numbers = #tpu.dot_dimension_numbers<[1], [0], [0], [1], [0, 0, 1, 1], [], []>} : vector<8x128xf32>, vector<128x128xf32>, vector<8x128xf32> -> vector<8x128xf32>
    %c0_17 = arith.constant 0 : index
    %c0_18 = arith.constant 0 : index
    %23 = vector.load %arg7[%c0_17, %c0_18] : memref<1x128xf32, #tpu.memory_space<vmem>>, vector<1x128xf32>
    %24 = vector.broadcast %23 : vector<1x128xf32> to vector<8x128xf32>
    %25 = arith.addf %22, %24 : vector<8x128xf32>
    %26 = math.tanh %25 : vector<8x128xf32>
    %cst_19 = arith.constant 2.000000e+00 : f32
    %27 = vector.broadcast %cst_19 : f32 to vector<8x128xf32>
    %28 = arith.mulf %26, %27 : vector<8x128xf32>
    %c0_20 = arith.constant 0 : index
    %c0_21 = arith.constant 0 : index
    %29 = vector.load %arg8[%c0_20, %c0_21] : memref<8x128xf32, #tpu.memory_space<vmem>>, vector<8x128xf32>
    tpu.vector_store %arg8[%c0_20, %c0_21], %28 {strides = array<i32>} : memref<8x128xf32, #tpu.memory_space<vmem>>, vector<8x128xf32>,
    return
  }
  func.func @transform_0(%arg0: i32) -> (i32, i32) {
    %c0_i32 = arith.constant 0 : i32
    %c0_i32_0 = arith.constant 0 : i32
    return %arg0, %c0_i32 : i32, i32
  }
  func.func @transform_1(%arg0: i32) -> (i32, i32) {
    %c0_i32 = arith.constant 0 : i32
    %c0_i32_0 = arith.constant 0 : i32
    %c0_i32_1 = arith.constant 0 : i32
    return %c0_i32, %c0_i32_0 : i32, i32
  }
  func.func @transform_2(%arg0: i32) -> (i32, i32) {
    %c0_i32 = arith.constant 0 : i32
    %c0_i32_0 = arith.constant 0 : i32
    %c0_i32_1 = arith.constant 0 : i32
    return %c0_i32, %c0_i32_0 : i32, i32
  }
  func.func @transform_3(%arg0: i32) -> (i32, i32) {
    %c0_i32 = arith.constant 0 : i32
    %c0_i32_0 = arith.constant 0 : i32
    %c0_i32_1 = arith.constant 0 : i32
    return %c0_i32, %c0_i32_0 : i32, i32
  }
  func.func @transform_4(%arg0: i32) -> (i32, i32) {
    %c0_i32 = arith.constant 0 : i32
    %c0_i32_0 = arith.constant 0 : i32
    %c0_i32_1 = arith.constant 0 : i32
    return %c0_i32, %c0_i32_0 : i32, i32
  }
  func.func @transform_5(%arg0: i32) -> (i32, i32) {
    %c0_i32 = arith.constant 0 : i32
    %c0_i32_0 = arith.constant 0 : i32
    %c0_i32_1 = arith.constant 0 : i32
    return %c0_i32, %c0_i32_0 : i32, i32
  }
  func.func @transform_6(%arg0: i32) -> (i32, i32) {
    %c0_i32 = arith.constant 0 : i32
    %c0_i32_0 = arith.constant 0 : i32
    %c0_i32_1 = arith.constant 0 : i32
    return %c0_i32, %c0_i32_0 : i32, i32
  }
  func.func @transform_7(%arg0: i32) -> (i32, i32) {
    %c0_i32 = arith.constant 0 : i32
    %c0_i32_0 = arith.constant 0 : i32
    return %arg0, %c0_i32 : i32, i32
  }
}

</mosaic_0001>

<bundles_post_ra>
// kernel: tpu_custom_call.1
= control target key start
LH: loop header
LB: loop body
LE: loop exit
PB: predicated region body
PF: predicated region fallthrough
CT: control target
= control target key end

     0   :  { %12 = vsyncpa [#allocation3], 0  ;;  %s745_s0 = inlined_call_operand.hbm [shape: f32[8,32], index: 0, kind: input, shape index: {}]   ;;  %s746_s1 = inlined_call_operand.hbm [shape: f32[32,128], index: 1, kind: input, shape index: {}]   ;;  %s747_s2 = inlined_call_operand.vmem [shape: f32[1,128], index: 2, kind: input, shape index: {}]   ;;  %s748_s3 = inlined_call_operand.hbm [shape: f32[128,128], index: 3, kind: input, shape index: {}]   ;;  %s749_s4 = inlined_call_operand.vmem [shape: f32[1,128], index: 4, kind: input, shape index: {}]   ;;  %s750_s5 = inlined_call_operand.hbm [shape: f32[128,128], index: 5, kind: input, shape index: {}]   ;;  %s751_s6 = inlined_call_operand.vmem [shape: f32[1,128], index: 6, kind: input, shape index: {}]   ;;  %s752_s7 = inlined_call_operand.hbm [shape: f32[8,128], index: 7, kind: output, shape index: {}]  }
   0x1   :  { %13 = vsyncpa [#allocation6], 0 }
   0x2   :  { %14 = vsyncpa [#allocation9], 0 }
   0x3   :  { %15 = vsyncpa [#allocation4], 0  ;;  %s621_s24 = smov [#allocation5]  }
   0x4   :  { %s31_s25 = sshll.u32 %s621_s24, 4  ;;  %s32_s25 = int_to_ptr.vmem [resolvable:$true] %s31_s25 }
   0x5   :  { %s521_s26 = scalar_lea.vmem %s32_s25, 512  ;;  %p526_p1 = scmp.lt.s32.totalorder %s32_s25, %s32_s25 }
   0x6   :  { %p522_p0 = scmp.ne.s32.totalorder %s32_s25, %s521_s26  ;;  %p527_p2 = scmp.lt.s32.totalorder %s521_s26, %s521_s26 }
   0x8   :  { %p528_p3 = por %p527_p2, %p526_p1 }
   0xa   :  { %p529_p4 = pnand %p528_p3, %p522_p0 }
   0xc   :  { %532 = shalt.err (!%p529_p4)
}
   0xd   :  { %s622_s27 = smov 128   ;;  %s623_s28 = smov 8  }
   0xe   :  { %37 = dma.hbm_to_vmem [thread:$0]  %s746_s1, 512, %s32_s25, [#allocation6], %s622_s27, %s622_s27, %s623_s28  }
   0xf   :  { %s624_s8 = smov [#allocation2]   ;;  %s625_s10 = smov [#allocation7]  }
  0x10   :  { %s22_s9 = sshll.u32 %s624_s8, 4  ;;  %s45_s11 = sshll.u32 %s625_s10, 4  ;;  %s23_s9 = int_to_ptr.vmem [resolvable:$true] %s22_s9  ;;  %s46_s11 = int_to_ptr.vmem [resolvable:$true] %s45_s11 }
  0x11   :  { %s541_s12 = scalar_lea.vmem %s23_s9, 128  ;;  %p546_p6 = scmp.lt.s32.totalorder %s23_s9, %s23_s9 }
  0x12   :  { %p542_p5 = scmp.ne.s32.totalorder %s23_s9, %s541_s12  ;;  %p547_p7 = scmp.lt.s32.totalorder %s541_s12, %s541_s12 }
  0x14   :  { %p548_p8 = por %p547_p7, %p546_p6 }
  0x16   :  { %p549_p9 = pnand %p548_p8, %p542_p5 }
  0x18   :  { %552 = shalt.err (!%p549_p9)
}
  0x19   :  { %25 = dma.hbm_to_vmem [thread:$0]  %s745_s0, 128, %s23_s9, [#allocation3]  }
  0x1a   :  { %s561_s15 = scalar_lea.vmem %s46_s11, 2048  ;;  %p566_p11 = scmp.lt.s32.totalorder %s46_s11, %s46_s11 }
  0x1b   :  { %p562_p10 = scmp.ne.s32.totalorder %s46_s11, %s561_s15  ;;  %p567_p12 = scmp.lt.s32.totalorder %s561_s15, %s561_s15 }
  0x1d   :  { %p568_p13 = por %p567_p12, %p566_p11 }
  0x1f   :  { %p569_p0 = pnand %p568_p13, %p562_p10 }
  0x21   :  { %572 = shalt.err (!%p569_p0)
}
  0x22   :  { %51 = dma.hbm_to_vmem [thread:$0]  %s748_s3, 2048, %s46_s11, [#allocation6], %s622_s27, %s622_s27, %s623_s28  }
  0x23   :  { %s626_s17 = smov [#allocation8]  }
  0x24   :  { %s59_s18 = sshll.u32 %s626_s17, 4  ;;  %s60_s18 = int_to_ptr.vmem [resolvable:$true] %s59_s18 }
  0x25   :  { %s581_s19 = scalar_lea.vmem %s60_s18, 2048  ;;  %p586_p2 = scmp.lt.s32.totalorder %s60_s18, %s60_s18 }
  0x26   :  { %p582_p1 = scmp.ne.s32.totalorder %s60_s18, %s581_s19  ;;  %p587_p3 = scmp.lt.s32.totalorder %s581_s19, %s581_s19 }
  0x28   :  { %p588_p4 = por %p587_p3, %p586_p2 }
  0x2a   :  { %p589_p5 = pnand %p588_p4, %p582_p1 }
  0x2c   :  { %592 = shalt.err (!%p589_p5)
}
  0x2d   :  { %65 = dma.hbm_to_vmem [thread:$0]  %s750_s5, 2048, %s60_s18, [#allocation9], %s622_s27, %s622_s27, %s623_s28  }
  0x2e   :  { %613 = dma.done.wait [#allocation3], 128  }
  0x2f   :  { %614 = vsyncadd [#allocation3], 4294967168 }
  0x30   :  { %615 = dma.done.wait [#allocation6], 2560  }
  0x31   :  { %616 = vsyncadd [#allocation6], 4294964736 }
  0x32   :  { %617 = dma.done.wait [#allocation9], 2048  }
  0x33   :  { %618 = vsyncadd [#allocation9], 4294965248  ;;  %v627_v0 = vmov 0.0   ;;  %vm628_vm0 = vmmov 0   ;;  %v84_v1 = vld [vmem:[#allocation5 + $0x18] sm:$0xff]  ;;  %v83_v2 = vld [vmem:[#allocation5 + $0x10] sm:$0xff] }
  0x34   :  { %421 = vmatprep.subr.mxu0 %v627_v0  ;;  %429 = vmatprep.mubr.msk.f32.mxu0 %vm628_vm0, %v627_v0  ;;  %v184_v3 = vld [vmem:[#allocation7 + $0x78] sm:$0xff]  ;;  %v82_v4 = vld [vmem:[#allocation5 + $0x8] sm:$0xff]  ;;  %v183_v5 = vld [vmem:[#allocation7 + $0x70] sm:$0xff]  ;;  %vm92_vm1 = vcmask 261120   ;;  %s629_s24 = smov [#allocation10]  }
  0x35   :  { %432 = vmatprep.subr.mxu1 %v627_v0  ;;  %464 = vmatprep.mubr.msk.f32.mxu1 %vm628_vm0, %v627_v0  ;;  %v182_v6 = vld [vmem:[#allocation7 + $0x68] sm:$0xff]  ;;  %v81_v7 = vld [vmem:[#allocation5] sm:$0xff]  ;;  %v80_v8 = vld [vmem:[#allocation2] sm:$0xff]  ;;  %s367_s25 = sshll.u32 %s629_s24, 4  ;;  %s368_s25 = int_to_ptr.vmem [resolvable:$true] %s367_s25 }
  0x36   :  { %422 = vmatpush3.msra.mxu0 %v84_v1  ;;  %433 = vmatpush3.msra.mxu1 %v184_v3  ;;  %v181_v9 = vld [vmem:[#allocation7 + $0x60] sm:$0xff]  ;;  %v180_v10 = vld [vmem:[#allocation7 + $0x58] sm:$0xff]  ;;  %v179_v11 = vld [vmem:[#allocation7 + $0x50] sm:$0xff]  ;;  %p598_p7 = scmp.lt.s32.totalorder %s368_s25, %s368_s25 }
  0x37   :  { %423 = vmatprep.subr.mxu0 %v627_v0  ;;  %434 = vmatprep.subr.mxu1 %v627_v0  ;;  %v178_v12 = vld [vmem:[#allocation7 + $0x48] sm:$0xff]  ;;  %v177_v13 = vld [vmem:[#allocation7 + $0x40] sm:$0xff]  ;;  %v176_v14 = vld [vmem:[#allocation7 + $0x38] sm:$0xff] }
  0x38   :  { %424 = vmatpush3.msra.mxu0 %v83_v2  ;;  %435 = vmatpush3.msra.mxu1 %v183_v5  ;;  %v175_v15 = vld [vmem:[#allocation7 + $0x30] sm:$0xff]  ;;  %v174_v16 = vld [vmem:[#allocation7 + $0x28] sm:$0xff]  ;;  %v173_v17 = vld [vmem:[#allocation7 + $0x20] sm:$0xff] }
  0x39   :  { %425 = vmatprep.subr.mxu0 %v627_v0  ;;  %436 = vmatprep.subr.mxu1 %v627_v0  ;;  %v172_v18 = vld [vmem:[#allocation7 + $0x18] sm:$0xff]  ;;  %v171_v19 = vld [vmem:[#allocation7 + $0x10] sm:$0xff]  ;;  %v170_v20 = vld [vmem:[#allocation7 + $0x8] sm:$0xff] }
  0x3a   :  { %426 = vmatpush3.msra.mxu0 %v82_v4  ;;  %437 = vmatpush3.msra.mxu1 %v182_v6  ;;  %v169_v21 = vld [vmem:[#allocation7] sm:$0xff]  ;;  %v280_v22 = vld [vmem:[#allocation8 + $0x78] sm:$0xff]  ;;  %v279_v23 = vld [vmem:[#allocation8 + $0x70] sm:$0xff] }
  0x3b   :  { %427 = vmatprep.subr.mxu0 %v627_v0  ;;  %438 = vmatprep.subr.mxu1 %v627_v0  ;;  %v278_v24 = vld [vmem:[#allocation8 + $0x68] sm:$0xff]  ;;  %v277_v25 = vld [vmem:[#allocation8 + $0x60] sm:$0xff]  ;;  %v276_v26 = vld [vmem:[#allocation8 + $0x58] sm:$0xff] }
  0x3c   :  { %428 = vmatpush3.msra.mxu0 %v81_v7  ;;  %439 = vmatpush3.msra.mxu1 %v181_v9  ;;  %v275_v27 = vld [vmem:[#allocation8 + $0x50] sm:$0xff]  ;;  %v274_v28 = vld [vmem:[#allocation8 + $0x48] sm:$0xff]  ;;  %v273_v29 = vld [vmem:[#allocation8 + $0x40] sm:$0xff] }
  0x3d   :  { %430 = vmatmul.mubr.msk.f32.vlgmr.msra.gmra.mxu0 %vm92_vm1, %v80_v8  ;;  %440 = vmatprep.subr.mxu1 %v627_v0  ;;  %v272_v30 = vld [vmem:[#allocation8 + $0x38] sm:$0xff]  ;;  %v271_v31 = vld [vmem:[#allocation8 + $0x30] sm:$0xff]  ;;  %v270_v32 = vld [vmem:[#allocation8 + $0x28] sm:$0xff] }
  0x3e   :  { %467 = vmatprep.subr.mxu0 %v627_v0  ;;  %441 = vmatpush3.msra.mxu1 %v180_v10  ;;  %v269_v33 = vld [vmem:[#allocation8 + $0x20] sm:$0xff]  ;;  %v268_v34 = vld [vmem:[#allocation8 + $0x18] sm:$0xff]  ;;  %v267_v41 = vld [vmem:[#allocation8 + $0x10] sm:$0xff] }
  0x3f   :  { %499 = vmatprep.mubr.msk.f32.mxu0 %vm628_vm0, %v627_v0  ;;  %442 = vmatprep.subr.mxu1 %v627_v0  ;;  %v378_v35 = vld [vmem:[%s747_s2] ss:$0 sm:$0xff]  ;;  %v266_v42 = vld [vmem:[#allocation8 + $0x8] sm:$0xff]  ;;  %v265_v43 = vld [vmem:[#allocation8] sm:$0xff] }
  0x40   :  { %443 = vmatpush3.msra.mxu1 %v179_v11  ;;  %468 = vmatpush3.msra.mxu0 %v280_v22  ;;  %v380_v44 = vld [vmem:[%s749_s4] ss:$0 sm:$0xff]  ;;  %s593_s4 = scalar_lea.vmem %s368_s25, 128 }
  0x41   :  { %444 = vmatprep.subr.mxu1 %v627_v0  ;;  %469 = vmatprep.subr.mxu0 %v627_v0  ;;  %v381_v50 = vld [vmem:[%s751_s6] ss:$0 sm:$0xff]  ;;  %p594_p6 = scmp.ne.s32.totalorder %s368_s25, %s593_s4  ;;  %p599_p8 = scmp.lt.s32.totalorder %s593_s4, %s593_s4 }
  0x42   :  { %445 = vmatpush3.msra.mxu1 %v178_v12  ;;  %470 = vmatpush3.msra.mxu0 %v279_v23 }
  0x43   :  { %446 = vmatprep.subr.mxu1 %v627_v0  ;;  %471 = vmatprep.subr.mxu0 %v627_v0  ;;  %p600_p9 = por %p599_p8, %p598_p7 }
  0x44   :  { %447 = vmatpush3.msra.mxu1 %v177_v13  ;;  %472 = vmatpush3.msra.mxu0 %v278_v24 }
  0x45   :  { %448 = vmatprep.subr.mxu1 %v627_v0  ;;  %473 = vmatprep.subr.mxu0 %v627_v0  ;;  %p601_p10 = pnand %p600_p9, %p594_p6 }
  0x46   :  { %449 = vmatpush3.msra.mxu1 %v176_v14  ;;  %474 = vmatpush3.msra.mxu0 %v277_v25 }
  0x47   :  { %450 = vmatprep.subr.mxu1 %v627_v0  ;;  %475 = vmatprep.subr.mxu0 %v627_v0 }
  0x48   :  { %451 = vmatpush3.msra.mxu1 %v175_v15  ;;  %476 = vmatpush3.msra.mxu0 %v276_v26 }
  0x49   :  { %452 = vmatprep.subr.mxu1 %v627_v0  ;;  %477 = vmatprep.subr.mxu0 %v627_v0 }
  0x4a   :  { %453 = vmatpush3.msra.mxu1 %v174_v16  ;;  %478 = vmatpush3.msra.mxu0 %v275_v27 }
  0x4b   :  { %454 = vmatprep.subr.mxu1 %v627_v0  ;;  %479 = vmatprep.subr.mxu0 %v627_v0 }
  0x4c   :  { %455 = vmatpush3.msra.mxu1 %v173_v17  ;;  %480 = vmatpush3.msra.mxu0 %v274_v28 }
  0x4d   :  { %456 = vmatprep.subr.mxu1 %v627_v0  ;;  %481 = vmatprep.subr.mxu0 %v627_v0 }
  0x4e   :  { %457 = vmatpush3.msra.mxu1 %v172_v18  ;;  %482 = vmatpush3.msra.mxu0 %v273_v29 }
  0x4f   :  { %458 = vmatprep.subr.mxu1 %v627_v0  ;;  %483 = vmatprep.subr.mxu0 %v627_v0 }
  0x50   :  { %459 = vmatpush3.msra.mxu1 %v171_v19  ;;  %484 = vmatpush3.msra.mxu0 %v272_v30 }
  0x51   :  { %460 = vmatprep.subr.mxu1 %v627_v0  ;;  %485 = vmatprep.subr.mxu0 %v627_v0 }
  0x52   :  { %461 = vmatpush3.msra.mxu1 %v170_v20  ;;  %486 = vmatpush3.msra.mxu0 %v271_v31 }
  0x53   :  { %462 = vmatprep.subr.mxu1 %v627_v0  ;;  %487 = vmatprep.subr.mxu0 %v627_v0 }
  0x54   :  { %463 = vmatpush3.msra.mxu1 %v169_v21  ;;  %488 = vmatpush3.msra.mxu0 %v270_v32 }
  0x55   :  { %489 = vmatprep.subr.mxu0 %v627_v0 }
  0x56   :  { %490 = vmatpush3.msra.mxu0 %v269_v33 }
  0x57   :  { %491 = vmatprep.subr.mxu0 %v627_v0 }
  0x58   :  { %492 = vmatpush3.msra.mxu0 %v268_v34 }
  0x59   :  { %493 = vmatprep.subr.mxu0 %v627_v0 }
  0x5a   :  { %494 = vmatpush3.msra.mxu0 %v267_v41 }
  0x5b   :  { %495 = vmatprep.subr.mxu0 %v627_v0 }
  0x5c   :  { %496 = vmatpush3.msra.mxu0 %v266_v42 }
  0x5d   :  { %497 = vmatprep.subr.mxu0 %v627_v0 }
  0x5e   :  { %498 = vmatpush3.msra.mxu0 %v265_v43 }
  0xfd   :  { %v162_v36 = vpop.f32.mrf.mxu0 }
  0xfe   :  { %v163_v37 = vadd.f32 %v378_v35, %v162_v36 }
  0xff   :  { %v431_v38 = vpop.f32.mrf.mxu0 }
 0x100   :  { %v167_v39 = vmul.f32 0.001, %v163_v37  ;;  %vm166_vm2 = vcmp.ge.f32.partialorder %v163_v37, 0.0 }
 0x102   :  { %v168_v40 = vsel %vm166_vm2, %v163_v37, %v167_v39 }
 0x103   :  { %465 = vmatmul.mubr.f32.vlgmr.msra.gmra.mxu1 %v168_v40 }
 0x1c3   :  { %v258_v45 = vpop.f32.mrf.mxu1 }
 0x1c4   :  { %v259_v46 = vadd.f32 %v380_v44, %v258_v45 }
 0x1c5   :  { %v466_v47 = vpop.f32.mrf.mxu1 }
 0x1c6   :  { %vm262_vm3 = vcmp.ge.f32.partialorder %v259_v46, 0.0  ;;  %v263_v48 = vmul.f32 0.001, %v259_v46 }
 0x1c8   :  { %v264_v49 = vsel %vm262_vm3, %v259_v46, %v263_v48 }
 0x1c9   :  { %500 = vmatmul.mubr.f32.vlgmr.msra.gmra.mxu0 %v264_v49 }
 0x289   :  { %v354_v51 = vpop.f32.mrf.mxu0 }
 0x28a   :  { %v355_v52 = vadd.f32 %v381_v50, %v354_v51 }
 0x28b   :  { %v501_v53 = vpop.f32.mrf.mxu0 }
 0x28c   :  { %511 = vtanh.f32 %v355_v52 }
 0x299   :  { %v512_v54 = vpop.eup %511 }
 0x29a   :  { %v359_v55 = vmul.f32 2.0, %v512_v54 }
 0x29c   :  { %360 = vst [vmem:[#allocation10] sm:$0xff] %v359_v55 }
 0x29d   :  { %604 = shalt.err (!%p601_p10)
}
 0x29e   :  { %370 = dma.vmem_to_hbm [thread:$0]  %s368_s25, 128, %s752_s7, [#allocation4]  }
 0x29f   :  { %619 = dma.done.wait [#allocation4], 128  }
 0x2a0   :  { %620 = vsyncadd [#allocation4], 4294967168 }
 0x2a1   :  { %374 = vsyncpa [#allocation3], 1 }
 0x2a2   :  { %375 = vsyncpa [#allocation6], 1 }
 0x2a3   :  { %376 = vsyncpa [#allocation9], 1 }
 0x2a4   :  { %377 = vsyncpa [#allocation4], 1 }

</bundles_post_ra>
